<compile_context>
chip_gen: v6e
topology: v6e:2x2x1
jax: 0.10.0
libtpu: 0.0.40
codegen_flags: <defaults>
</compile_context>

<pallas_src>
import jax
import jax.numpy as jnp
from jax.experimental import pallas as pl
from jax.experimental.pallas import tpu as pltpu


def _round_up(v, m):
    return ((v + m - 1) // m) * m


def nodecell_kernel(x_ref, ch_ref, w_ref, out_ref):
    TB, Fp = x_ref.shape          # node tile, padded feature dim (incl. bias col)
    N = ch_ref.shape[0]           # children per node (static)
    Hp = out_ref.shape[1]         # padded hidden dim (multiple of 128)
    inv_n = 1.0 / N

    x = x_ref[...]                # (TB, Fp)  -- column F is the constant 1 (bias)
    ch = ch_ref[...]              # (N, TB, Hp)

    # h = mean of children hidden states
    h = jnp.sum(ch, axis=0) * inv_n                        # (TB, Hp)

    # Static views into the packed weight slab (no runtime cost).
    w_x_all = w_ref[0:Fp, :]                               # (Fp, 3Hp) = [Wx|Ux|Tx] + bias row
    w_h_rz = w_ref[Fp:Fp + Hp, 0:2 * Hp]                   # (Hp, 2Hp) = [Wh|Uh]
    w_h_t = w_ref[Fp:Fp + Hp, 2 * Hp:3 * Hp]               # (Hp, Hp)  =  Th

    # Fused gate matmuls (biases arrive via the "1" column of x).
    xg = jnp.dot(x, w_x_all, preferred_element_type=jnp.float32)   # (TB, 3Hp)
    hg = jnp.dot(h, w_h_rz, preferred_element_type=jnp.float32)    # (TB, 2Hp)

    r = jax.nn.sigmoid(xg[:, 0:Hp] + hg[:, 0:Hp])                  # (TB, Hp)
    z = jax.nn.sigmoid(xg[:, Hp:2 * Hp] + hg[:, Hp:2 * Hp])        # (TB, Hp)
    tx_b = xg[:, 2 * Hp:3 * Hp]                                    # (TB, Hp) = x@Tx + tb

    # trans_i = tanh(x @ Tx + tb + (r * h_i) @ Th), batched over children.
    rh = r[None, :, :] * ch                                        # (N, TB, Hp)
    tg = jax.lax.dot_general(rh, w_h_t,
                             dimension_numbers=(((2,), (0,)), ((), ())),
                             preferred_element_type=jnp.float32)   # (N, TB, Hp)
    trans_mean = jnp.sum(jnp.tanh(tx_b[None, :, :] + tg), axis=0) * inv_n   # (TB, Hp)

    # next_h = mean_i[(1-z)*h_i + z*trans_i] = (1-z)*h + z*trans_mean
    out_ref[...] = (h + z * (trans_mean - h)).astype(out_ref.dtype)


def _pack_params(wx, wh, wb, ux, uh, ub, tx, th, tb, Fp, Hp):
    """Pack the 3 Linear layers (+ biases) into one zero-padded weight slab.

    Rows 0..F-1   : [Wx | Ux | Tx]
    Row  F        : [wb | ub | tb]   (picked up by the constant-1 column of x)
    Rows F+1..Fp-1: zeros
    Rows Fp..Fp+Hp: [Wh | Uh | Th]   (zero-padded to Hp)
    """
    F, H = wx.shape
    ph = Hp - H
    pad_c = lambda w: jnp.pad(w, ((0, 0), (0, ph)))    # (*, H) -> (*, Hp)
    pad_hh = lambda w: jnp.pad(w, ((0, ph), (0, ph)))  # (H, H) -> (Hp, Hp)

    x_rows = jnp.concatenate([pad_c(wx), pad_c(ux), pad_c(tx)], axis=1)   # (F, 3Hp)
    b_row = jnp.concatenate([pad_c(wb), pad_c(ub), pad_c(tb)], axis=1)    # (1, 3Hp)
    x_block = jnp.concatenate([x_rows, b_row], axis=0)                    # (F+1, 3Hp)
    x_block = jnp.pad(x_block, ((0, Fp - (F + 1)), (0, 0)))               # (Fp, 3Hp)

    h_block = jnp.concatenate([pad_hh(wh), pad_hh(uh), pad_hh(th)], axis=1)  # (Hp, 3Hp)
    return jnp.concatenate([x_block, h_block], axis=0).astype(jnp.float32)   # (Fp+Hp, 3Hp)


def node_cell_forward_batched(x, children, wx, wh, wb, ux, uh, ub, tx, th, tb,
                              *, node_tile=256):
    """Batched NodeCell over many nodes sharing the same child count.

    x: (B, F) node features; children: (N, B, H) stacked children hidden states.
    Returns (B, H).
    """
    # TODO(synk): real trees with ragged per-node child counts need per-node
    # masking of padded child rows before the two means; assumed uniform here.
    B, F = x.shape
    N, B2, H = children.shape
    assert B2 == B

    Fp = _round_up(F + 1, 8)                     # +1 for the fused bias column
    Hp = _round_up(H, 128)                       # lane-dense hidden dim
    TB = min(_round_up(B, 8), _round_up(node_tile, 8))
    Bp = _round_up(B, TB)

    x_p = jnp.pad(x.astype(jnp.float32), ((0, Bp - B), (0, Fp - F)))
    x_p = x_p.at[:, F].set(1.0)                  # bias column
    ch_p = jnp.pad(children.astype(jnp.float32),
                   ((0, 0), (0, Bp - B), (0, Hp - H)))
    w_all = _pack_params(wx, wh, wb, ux, uh, ub, tx, th, tb, Fp, Hp)

    grid = (Bp // TB,)
    flops = 2 * Bp * (Fp * 3 * Hp + Hp * 2 * Hp + N * Hp * Hp) + (3 * N + 8) * Bp * Hp
    transcendentals = Bp * (2 + N) * Hp
    bytes_accessed = 4 * (x_p.size + ch_p.size + w_all.size + Bp * Hp)

    out = pl.pallas_call(
        nodecell_kernel,
        out_shape=jax.ShapeDtypeStruct((Bp, Hp), jnp.float32),
        grid_spec=pltpu.PrefetchScalarGridSpec(
            num_scalar_prefetch=0,
            grid=grid,
            in_specs=[
                pl.BlockSpec((TB, Fp), lambda i: (i, 0)),           # per-node features
                pl.BlockSpec((N, TB, Hp), lambda i: (0, i, 0)),     # children slab
                pl.BlockSpec((Fp + Hp, 3 * Hp), lambda i: (0, 0)),  # weights: resident
            ],
            out_specs=pl.BlockSpec((TB, Hp), lambda i: (i, 0)),
        ),
        compiler_params=pltpu.CompilerParams(
            dimension_semantics=("parallel",)),
        cost_estimate=pl.CostEstimate(flops=flops,
                                      transcendentals=transcendentals,
                                      bytes_accessed=bytes_accessed),
    )(x_p, ch_p, w_all)
    return out[:B, :H]


def node_cell_forward(x_vec, children_hs, *params):
    """Single-node interface matching the torch module: x (F,), list of (H,)."""
    x = x_vec.reshape(1, -1)
    ch = jnp.stack(children_hs)[:, None, :]          # (N, 1, H)
    out = node_cell_forward_batched(x, ch, *params, node_tile=8)
    return out[0]


def _linear_params(key, in_dim, out_dim):
    # Deterministic nn.Linear-style init: U(-1/sqrt(in), 1/sqrt(in)).
    kw, kb = jax.random.split(key)
    bound = 1.0 / jnp.sqrt(in_dim)
    w_t = jax.random.uniform(kw, (in_dim, out_dim), jnp.float32, -bound, bound)
    b = jax.random.uniform(kb, (1, out_dim), jnp.float32, -bound, bound)
    return w_t, b


def _reference_batched(x, children, wx, wh, wb, ux, uh, ub, tx, th, tb):
    # Pure-JAX reference mirroring the torch forward, batched over nodes.
    N = children.shape[0]
    h = jnp.sum(children, axis=0) / N                           # (B, H)
    r = jax.nn.sigmoid(x @ wx + h @ wh + wb)                    # (B, H)
    z = jax.nn.sigmoid(x @ ux + h @ uh + ub)                    # (B, H)
    trans = jnp.tanh((x @ tx + tb)[None] + (r[None] * children) @ th)   # (N, B, H)
    comb = (1.0 - z)[None] * children + z[None] * trans
    return jnp.sum(comb, axis=0) / N


if __name__ == "__main__":
    FEATURE_DIM = 8
    HIDDEN = 32
    NUM_CHILDREN = 4
    NUM_NODES = 16            # e.g. all tree nodes at one depth, batched

    key = jax.random.PRNGKey(0)
    k_x, k_ch, k_w, k_u, k_t = jax.random.split(key, 5)

    x = jax.random.normal(k_x, (NUM_NODES, FEATURE_DIM), jnp.float32)
    children = jax.random.normal(k_ch, (NUM_CHILDREN, NUM_NODES, HIDDEN), jnp.float32)

    # Parameters: each Linear maps (FEATURE_DIM + HIDDEN) -> HIDDEN.
    in_dim = FEATURE_DIM + HIDDEN
    w_t, wb = _linear_params(k_w, in_dim, HIDDEN)
    u_t, ub = _linear_params(k_u, in_dim, HIDDEN)
    t_t, tb = _linear_params(k_t, in_dim, HIDDEN)
    wx, wh = w_t[:FEATURE_DIM], w_t[FEATURE_DIM:]
    ux, uh = u_t[:FEATURE_DIM], u_t[FEATURE_DIM:]
    tx, th = t_t[:FEATURE_DIM], t_t[FEATURE_DIM:]
    params = (wx, wh, wb, ux, uh, ub, tx, th, tb)

    # Batched path (node_tile=8 -> grid of 2 steps to exercise the pipeline).
    out = node_cell_forward_batched(x, children, *params, node_tile=8)
    out = jax.block_until_ready(out)
    ref = _reference_batched(x, children, *params)
    assert out.shape == (NUM_NODES, HIDDEN)
    assert jnp.allclose(out, ref, atol=1e-5, rtol=1e-5)

    # Single-node interface (same semantics as the torch module's forward).
    out1 = node_cell_forward(x[0], [children[i, 0] for i in range(NUM_CHILDREN)],
                             *params)
    out1 = jax.block_until_ready(out1)
    assert out1.shape == (HIDDEN,)
    assert jnp.allclose(out1, ref[0], atol=1e-5, rtol=1e-5)

    print("KERNEL_OK")
</pallas_src>

<mosaic_0001>
module attributes {stable_mosaic.version = 11 : i64} {
  func.func @nodecell_kernel(%arg0: i32, %arg1: memref<8x16xf32, #tpu.memory_space<vmem>>, %arg2: memref<4x8x128xf32, #tpu.memory_space<vmem>>, %arg3: memref<144x384xf32, #tpu.memory_space<vmem>>, %arg4: memref<8x128xf32, #tpu.memory_space<vmem>>) attributes {dimension_semantics = [#tpu.dimension_semantics<parallel>], iteration_bounds = array<i64: 2>, scalar_prefetch = 0 : i64, scratch_operands = 0 : i64, tpu.core_type = #tpu.core_type<tc>, window_params = [{transform_indices = @transform_0, window_bounds = array<i64: 8, 16>}, {transform_indices = @transform_1, window_bounds = array<i64: 4, 8, 128>}, {pipeline_mode = #tpu.pipeline_mode<synchronous>, transform_indices = @transform_2, window_bounds = array<i64: 144, 384>}, {transform_indices = @transform_3, window_bounds = array<i64: 8, 128>}]} {
    %c0 = arith.constant 0 : index
    %c0_0 = arith.constant 0 : index
    %0 = vector.load %arg1[%c0, %c0_0] : memref<8x16xf32, #tpu.memory_space<vmem>>, vector<8x16xf32>
    %c0_1 = arith.constant 0 : index
    %c0_2 = arith.constant 0 : index
    %c0_3 = arith.constant 0 : index
    %1 = vector.load %arg2[%c0_1, %c0_2, %c0_3] : memref<4x8x128xf32, #tpu.memory_space<vmem>>, vector<4x8x128xf32>
    %cst = arith.constant dense<0.000000e+00> : vector<8x128xf32>
    %2 = vector.multi_reduction <add>, %1, %cst [0] : vector<4x8x128xf32> to vector<8x128xf32>
    %cst_4 = arith.constant 2.500000e-01 : f32
    %3 = vector.broadcast %cst_4 : f32 to vector<8x128xf32>
    %4 = arith.mulf %2, %3 : vector<8x128xf32>
    %c0_5 = arith.constant 0 : index
    %c0_6 = arith.constant 0 : index
    %5 = vector.load %arg3[%c0_5, %c0_6] : memref<144x384xf32, #tpu.memory_space<vmem>>, vector<16x384xf32>
    %c16 = arith.constant 16 : index
    %c0_7 = arith.constant 0 : index
    %6 = vector.load %arg3[%c16, %c0_7] : memref<144x384xf32, #tpu.memory_space<vmem>>, vector<128x256xf32>
    %c16_8 = arith.constant 16 : index
    %c256 = arith.constant 256 : index
    %7 = vector.load %arg3[%c16_8, %c256] : memref<144x384xf32, #tpu.memory_space<vmem>>, vector<128x128xf32>
    %cst_9 = arith.constant dense<0.000000e+00> : vector<8x384xf32>
    %8 = tpu.matmul %0, %5, %cst_9 {dimension_numbers = #tpu.dot_dimension_numbers<[1], [0], [0], [1], [0, 0, 1, 1], [], []>} : vector<8x16xf32>, vector<16x384xf32>, vector<8x384xf32> -> vector<8x384xf32>
    %cst_10 = arith.constant dense<0.000000e+00> : vector<8x256xf32>
    %9 = tpu.matmul %4, %6, %cst_10 {dimension_numbers = #tpu.dot_dimension_numbers<[1], [0], [0], [1], [0, 0, 1, 1], [], []>} : vector<8x128xf32>, vector<128x256xf32>, vector<8x256xf32> -> vector<8x256xf32>
    %10 = vector.extract_strided_slice %8 {offsets = [0, 0], sizes = [8, 128], strides = [1, 1]} : vector<8x384xf32> to vector<8x128xf32>
    %11 = vector.extract_strided_slice %9 {offsets = [0, 0], sizes = [8, 128], strides = [1, 1]} : vector<8x256xf32> to vector<8x128xf32>
    %12 = arith.addf %10, %11 : vector<8x128xf32>
    %13 = arith.negf %12 : vector<8x128xf32>
    %14 = math.exp %13 : vector<8x128xf32>
    %cst_11 = arith.constant 1.000000e+00 : f32
    %15 = vector.broadcast %cst_11 : f32 to vector<8x128xf32>
    %16 = arith.addf %15, %14 : vector<8x128xf32>
    %17 = arith.divf %15, %16 : vector<8x128xf32>
    %18 = vector.extract_strided_slice %8 {offsets = [0, 128], sizes = [8, 128], strides = [1, 1]} : vector<8x384xf32> to vector<8x128xf32>
    %19 = vector.extract_strided_slice %9 {offsets = [0, 128], sizes = [8, 128], strides = [1, 1]} : vector<8x256xf32> to vector<8x128xf32>
    %20 = arith.addf %18, %19 : vector<8x128xf32>
    %21 = arith.negf %20 : vector<8x128xf32>
    %22 = math.exp %21 : vector<8x128xf32>
    %cst_12 = arith.constant 1.000000e+00 : f32
    %23 = vector.broadcast %cst_12 : f32 to vector<8x128xf32>
    %24 = arith.addf %23, %22 : vector<8x128xf32>
    %25 = arith.divf %23, %24 : vector<8x128xf32>
    %26 = vector.extract_strided_slice %8 {offsets = [0, 256], sizes = [8, 128], strides = [1, 1]} : vector<8x384xf32> to vector<8x128xf32>
    %27 = vector.shape_cast %17 : vector<8x128xf32> to vector<1x8x128xf32>
    %28 = vector.broadcast %27 : vector<1x8x128xf32> to vector<4x8x128xf32>
    %29 = arith.mulf %28, %1 : vector<4x8x128xf32>
    %cst_13 = arith.constant dense<0.000000e+00> : vector<4x8x128xf32>
    %30 = tpu.matmul %29, %7, %cst_13 {dimension_numbers = #tpu.dot_dimension_numbers<[2], [0], [0, 1], [1], [0, 0, 0, 1, 1, 1], [], []>} : vector<4x8x128xf32>, vector<128x128xf32>, vector<4x8x128xf32> -> vector<4x8x128xf32>
    %31 = vector.shape_cast %26 : vector<8x128xf32> to vector<1x8x128xf32>
    %32 = vector.broadcast %31 : vector<1x8x128xf32> to vector<4x8x128xf32>
    %33 = arith.addf %32, %30 : vector<4x8x128xf32>
    %34 = math.tanh %33 : vector<4x8x128xf32>
    %cst_14 = arith.constant dense<0.000000e+00> : vector<8x128xf32>
    %35 = vector.multi_reduction <add>, %34, %cst_14 [0] : vector<4x8x128xf32> to vector<8x128xf32>
    %cst_15 = arith.constant 2.500000e-01 : f32
    %36 = vector.broadcast %cst_15 : f32 to vector<8x128xf32>
    %37 = arith.mulf %35, %36 : vector<8x128xf32>
    %38 = arith.subf %37, %4 : vector<8x128xf32>
    %39 = arith.mulf %25, %38 : vector<8x128xf32>
    %40 = arith.addf %4, %39 : vector<8x128xf32>
    %c0_16 = arith.constant 0 : index
    %c0_17 = arith.constant 0 : index
    %41 = vector.load %arg4[%c0_16, %c0_17] : memref<8x128xf32, #tpu.memory_space<vmem>>, vector<8x128xf32>
    tpu.vector_store %arg4[%c0_16, %c0_17], %40 {strides = array<i32>} : memref<8x128xf32, #tpu.memory_space<vmem>>, vector<8x128xf32>,
    return
  }
  func.func @transform_0(%arg0: i32) -> (i32, i32) {
    %c0_i32 = arith.constant 0 : i32
    %c0_i32_0 = arith.constant 0 : i32
    return %arg0, %c0_i32 : i32, i32
  }
  func.func @transform_1(%arg0: i32) -> (i32, i32, i32) {
    %c0_i32 = arith.constant 0 : i32
    %c0_i32_0 = arith.constant 0 : i32
    %c0_i32_1 = arith.constant 0 : i32
    return %c0_i32, %arg0, %c0_i32_0 : i32, i32, i32
  }
  func.func @transform_2(%arg0: i32) -> (i32, i32) {
    %c0_i32 = arith.constant 0 : i32
    %c0_i32_0 = arith.constant 0 : i32
    %c0_i32_1 = arith.constant 0 : i32
    return %c0_i32, %c0_i32_0 : i32, i32
  }
  func.func @transform_3(%arg0: i32) -> (i32, i32) {
    %c0_i32 = arith.constant 0 : i32
    %c0_i32_0 = arith.constant 0 : i32
    return %arg0, %c0_i32 : i32, i32
  }
}

</mosaic_0001>

<bundles_post_ra>
// kernel: tpu_custom_call.1
= control target key start
LH: loop header
LB: loop body
LE: loop exit
PB: predicated region body
PF: predicated region fallthrough
CT: control target
= control target key end

     0   :  { %8 = vsyncpa [#allocation3], 0  ;;  %s1364_s0 = inlined_call_operand.hbm [shape: f32[16,16], index: 0, kind: input, shape index: {}]   ;;  %s1365_s1 = inlined_call_operand.hbm [shape: f32[4,16,128], index: 1, kind: input, shape index: {}]   ;;  %s1366_s2 = inlined_call_operand.hbm [shape: f32[144,384], index: 2, kind: input, shape index: {}]   ;;  %s1367_s3 = inlined_call_operand.hbm [shape: f32[16,128], index: 3, kind: output, shape index: {}]  }
   0x1   :  { %10 = vsyncpa [#allocation3 + $0x1], 0 }
   0x2   :  { %11 = vsyncpa [#allocation6], 0 }
   0x3   :  { %13 = vsyncpa [#allocation6 + $0x1], 0 }
   0x4   :  { %14 = vsyncpa [#allocation4], 0 }
   0x5   :  { %16 = vsyncpa [#allocation4 + $0x1], 0  ;;  %s1114_s12 = smov 0   ;;  %s1116_s13 = smov 0  }
   0x6   :  { %s1118_s14 = smov 0   ;;  %s1120_s15 = smov 0  }
   0x7 LB: > { %s1135_s16 = sadd.s32 4294967295, %s1081_s15   ;;  %s753_s17 = sadd.s32 4294967294, %s1081_s15   ;;  %s1081_s15 = sphi %s1120_s15, %s1389_s15   ;;  %s1077_s14 = sphi %s1118_s14, %s1388_s14   ;;  %s1073_s13 = sphi %s1116_s13, %s1387_s13   ;;  %s1069_s12 = sphi %s1114_s12, %s1386_s12  }
   0x8   : > { %p42_p0 = scmp.ne.s32.totalorder %s1073_s13, %s1069_s12  ;;  %p1368_p1 = scmp.eq.s32.totalorder %s1135_s16, 0 }
   0x9   : > { %p119_p3 = scmp.eq.s32.totalorder %s753_s17, 1  ;;  %p754_p5 = scmp.ge.s32.totalorder %s1081_s15, 1 }
   0xa   : > { %p1144_p4 = por %p1368_p1, %p42_p0  ;;  %p126_p7 = scmp.lt.s32.totalorder %s1081_s15, 3 }
   0xb   : > { %p1149_p6 = por %p119_p3, %p42_p0  ;;  %s1083_s21 = smov [#allocation7]  }
   0xc   : > { %s1372_s18 = scalar_select %p1144_p4, 1, 0 }
   0xd   : > { %s1373_s19 = scalar_select %p1149_p6, 1, 0 }
   0xe   : > { %p1154_p8 = pnand %p754_p5, %p126_p7  ;;  %s138_s22 = sshll.u32 %s1083_s21, 4  ;;  %s139_s22 = int_to_ptr.vmem [resolvable:$true] %s138_s22 }
   0xf   : > { %s1168_s24 = sadd.s32 1, %s1081_s15   ;;  %s29_s25 = sadd.s32 1, %s1077_s14 }
  0x10   : > { %s1374_s20 = scalar_select %p1154_p8, 1, 0 }
  0x11   : > { %p852_p9 = pneg %p1154_p8  ;;  %s26_s26 = ssub.s32 %s1081_s15, %s1168_s24 }
  0x12   : > { %s938_s27 = scalar_lea.vmem %s139_s22, 6912  ;;  %p946_p5 = scmp.lt.s32.totalorder %s139_s22, %s139_s22 }
  0x13   : > { %p1163_p11 = pnand %p852_p9, %p1368_p1  ;;  %p939_p13 = scmp.ne.s32.totalorder %s139_s22, %s938_s27 }
  0x14   : > { %p947_p7 = scmp.lt.s32.totalorder %s938_s27, %s938_s27 }
  0x15   : > { %p929_p12 = pneg %p1163_p11 }
  0x16   : > { %p948_p10 = por %p947_p7, %p946_p5 }
  0x17   : > { %p941_p0 = pnand %p939_p13, %p929_p12 }
  0x19   : > { %p942_p3 = pneg %p941_p0 }
  0x1b   : > { %p949_p2 = pnand %p948_p10, %p942_p3 }
  0x1d   : > { %952 = shalt.err (!%p949_p2)
}
  0x1e   : > { %s1084_s28 = smov 384   ;;  %s1085_s29 = smov 24  }
  0x1f   : > { %855 = dma.hbm_to_vmem [thread:$0]  (!%p1163_p11), %s1366_s2, 6912, %s139_s22, [#allocation6], %s1084_s28, %s1084_s28, %s1085_s29  }
  0x20   : > { %p27_p9 = scmp.eq.s32.totalorder %s26_s26, 0  ;;  %p36_p10 = scmp.ne.s32.totalorder %s1077_s14, %s1073_s13 }
  0x21   : > { %p37_p2 = scmp.eq.s32.totalorder %s1081_s15, 0  ;;  %p868_p12 = scmp.lt.s32.totalorder %s1081_s15, 2 }
  0x22   : > { %s1185_s5 = scalar_select %p27_p9, %s1077_s14, %s29_s25  }
  0x23   : > { %p38_p13 = por %p37_p2, %p36_p10  ;;  %p1376_p0 = scmp.eq.s32.totalorder %s1135_s16, 1 }
  0x24   : > { %s1194_s7 = sand.u32 1, %s1077_s14   ;;  %s758_s8 = sshll.u32 %s1081_s15, 7 }
  0x25   : > { %p1189_p3 = por %p1376_p0, %p36_p10  ;;  %s757_s9 = sshll.u32 %s1194_s7, 3 }
  0x26   : > { %s1203_s17 = scalar_lea.hbm %s1364_s0, %s758_s8  ;;  %s156_s21 = scalar_lea.vmem [#allocation2], %s757_s9 }
  0x27   : > { %s1377_s6 = scalar_select %p1189_p3, 1, 0 }
  0x28   : > { %s163_s22 = sshll.u32 %s156_s21, 4  ;;  %p1205_p11 = pnand %p868_p12, %p38_p13  ;;  %s164_s22 = int_to_ptr.vmem [resolvable:$true] %s163_s22 }
  0x29   : > { %s759_s25 = sshll.u32 %s1194_s7, 5  ;;  %s153_s26 = scalar_lea.sflag [#allocation3], %s1194_s7 }
  0x2a   : > { %s953_s27 = scalar_lea.hbm %s1203_s17, 128  ;;  %p955_p7 = pneg %p1205_p11 }
  0x2b   : > { %p954_p5 = scmp.ne.s32.totalorder %s1203_s17, %s953_s27  ;;  %s958_s30 = scalar_lea.hbm %s1364_s0, 256 }
  0x2c   : > { %p959_p2 = scmp.lt.s32.totalorder %s1203_s17, %s1364_s0  ;;  %p960_p12 = scmp.lt.s32.totalorder %s958_s30, %s953_s27 }
  0x2d   : > { %p956_p9 = pnand %p955_p7, %p954_p5 }
  0x2e   : > { %p961_p13 = por %p960_p12, %p959_p2 }
  0x2f   : > { %p957_p10 = pneg %p956_p9 }
  0x31   : > { %p962_p0 = pnand %p961_p13, %p957_p10 }
  0x33   : > { %965 = shalt.err (!%p962_p0)
}
  0x34   : > { %s966_s7 = scalar_lea.vmem %s164_s22, 128  ;;  %s1086_s10 = smov [#allocation2]  }
  0x35   : > { %p967_p1 = scmp.ne.s32.totalorder %s164_s22, %s966_s7  ;;  %s971_s11 = sshll.u32 %s1086_s10, 4  ;;  %s972_s11 = int_to_ptr.vmem [resolvable:$false] %s971_s11 }
  0x36   : > { %s973_s21 = scalar_lea.vmem %s972_s11, 256  ;;  %p974_p9 = scmp.lt.s32.totalorder %s164_s22, %s972_s11 }
  0x37   : > { %p969_p6 = pnand %p967_p1, %p955_p7  ;;  %p975_p3 = scmp.lt.s32.totalorder %s973_s21, %s966_s7 }
  0x39   : > { %p970_p5 = pneg %p969_p6  ;;  %p976_p4 = por %p975_p3, %p974_p9 }
  0x3b   : > { %p977_p8 = pnand %p976_p4, %p970_p5 }
  0x3d   : > { %980 = shalt.err (!%p977_p8)
}
  0x3e   : > { %859 = dma.hbm_to_vmem [thread:$0]  (!%p1205_p11), %s1203_s17, 128, %s164_s22, %s153_s26  }
  0x3f   : > { %s1236_s29 = scalar_lea.hbm %s1365_s1, %s758_s8  ;;  %s174_s30 = scalar_lea.vmem [#allocation5], %s759_s25 }
  0x40   : > { %s180_s4 = sshll.u32 %s174_s30, 4  ;;  %s170_s9 = sand.u32 1, %s1081_s15   ;;  %s1238_s4 = int_to_ptr.vmem [resolvable:$true] %s180_s4 }
  0x41   : > { %s1241_s7 = scalar_lea.sflag [#allocation6], %s170_s9  ;;  %s981_s10 = scalar_lea.hbm %s1236_s29, 512 }
  0x42   : > { %p982_p1 = scmp.ne.s32.totalorder %s1236_s29, %s981_s10  ;;  %s986_s8 = scalar_lea.hbm %s1365_s1, 1024 }
  0x43   : > { %p987_p8 = scmp.lt.s32.totalorder %s1236_s29, %s1365_s1  ;;  %p988_p3 = scmp.lt.s32.totalorder %s986_s8, %s981_s10 }
  0x44   : > { %p984_p4 = pnand %p982_p1, %p955_p7 }
  0x45   : > { %p989_p10 = por %p988_p3, %p987_p8 }
  0x46   : > { %p985_p6 = pneg %p984_p4 }
  0x48   : > { %p990_p2 = pnand %p989_p10, %p985_p6 }
  0x4a   : > { %993 = shalt.err (!%p990_p2)
}
  0x4b   : > { %s994_s25 = scalar_lea.vmem %s1238_s4, 512  ;;  %s1087_s21 = smov [#allocation5]  }
  0x4c   : > { %p995_p12 = scmp.ne.s32.totalorder %s1238_s4, %s994_s25  ;;  %s999_s27 = sshll.u32 %s1087_s21, 4  ;;  %s1000_s27 = int_to_ptr.vmem [resolvable:$false] %s999_s27 }
  0x4d   : > { %s1001_s28 = scalar_lea.vmem %s1000_s27, 1024  ;;  %p1002_p5 = scmp.lt.s32.totalorder %s1238_s4, %s1000_s27 }
  0x4e   : > { %p997_p13 = pnand %p995_p12, %p955_p7  ;;  %p1003_p9 = scmp.lt.s32.totalorder %s1001_s28, %s994_s25 }
  0x50   : > { %p998_p0 = pneg %p997_p13  ;;  %p1004_p1 = por %p1003_p9, %p1002_p5 }
  0x52   : > { %p1005_p4 = pnand %p1004_p1, %p998_p0 }
  0x54   : > { %1008 = shalt.err (!%p1005_p4)
}
  0x55   : > { %s1088_s30 = smov 256   ;;  %s1089_s9 = smov 128  }
  0x56   : > { %s1090_s10 = smov 8   ;;  %p1379_p7 = scmp.ne.s32.totalorder %s1374_s20, 0 }
  0x57   : > { %862 = dma.hbm_to_vmem [thread:$0]  (!%p1205_p11), %s1236_s29, 512, %s1238_s4, %s1241_s7, %s1088_s30, %s1089_s9, %s1090_s10  }
  0x58   : > { %192 = sbr.rel (%p1379_p7) target bundleno = 608 (0x260), region = 32  ;;  %s1269_s17 = sand.u32 (!%p1379_p7), 1, %s1073_s13  }
  0x59   : > { %s762_s22 = sshll.u32 (!%p1379_p7), %s1269_s17, 3  ;;  %s195_s8 = scalar_lea.sflag (!%p1379_p7), [#allocation3], %s1269_s17 }
  0x5a   : > { %s198_s26 = scalar_lea.vmem (!%p1379_p7), [#allocation2], %s762_s22  ;;  %p1380_p6 = scmp.ne.s32.totalorder (!%p1379_p7), %s1372_s18, 0 }
  0x5d   : > { %1052 = dma.done.wait (%p1380_p6), %s195_s8, 128  }
  0x5e   : > { %1054 = vsyncadd (%p1380_p6), %s195_s8, 4294967168  ;;  %s203_s20 = sand.u32 1, %s1135_s16   ;;  %s763_s23 = sshll.u32 %s1269_s17, 5 }
  0x5f   : > { %s204_s29 = scalar_lea.sflag [#allocation6], %s203_s20  ;;  %s1281_s4 = scalar_lea.vmem [#allocation5], %s763_s23 }
  0x60   : > { %1056 = dma.done.wait (%p1380_p6), %s204_s29, 512  }
  0x61   : > { %1058 = vsyncadd (%p1380_p6), %s204_s29, 4294966784  ;;  %p1381_p11 = scmp.eq.s32.totalorder %s1135_s16, 0 }
  0x63   : > { %1060 = dma.done.wait (%p1381_p11), [#allocation6], 6912   ;;  %p1382_p8 = pmov %p1381_p11 }
  0x64   : > { %v1091_v0 = vmov 0.0   ;;  %v252_v1 = vld [vmem:[#allocation7 + $0x20] sm:$0xff]  ;;  %v251_v2 = vld [vmem:[#allocation7 + $0x18] sm:$0xff]  ;;  %v249_v3 = vld [vmem:[#allocation7 + $0x8] sm:$0xff]  ;;  %vm302_vm0 = vcmask 130048   ;;  %vm1092_vm1 = vmmov 0  }
  0x65   : > { %1062 = vsyncadd (%p1382_p8), [#allocation6], 4294960384  ;;  %370 = vmatprep.mubr.f32.mxu0 %v1091_v0  ;;  %797 = vmatprep.subr.mxu1 %v1091_v0  ;;  %v248_v4 = vld [vmem:[#allocation7] sm:$0xff]  ;;  %v1293_v5 = vld [vmem:[%s198_s26] sm:$0xff]  ;;  %s771_s18 = sshll.u32 %s1135_s16, 7  ;;  %s238_s7 = scalar_lea.vmem [#allocation8], %s762_s22 }
  0x66   : > { %334 = vmatprep.subr.mxu0 %v252_v1  ;;  %v285_v6 = vld [vmem:[#allocation7 + $0x1a0] sm:$0xff]  ;;  %v284_v7 = vld [vmem:[#allocation7 + $0x198] sm:$0xff]  ;;  %v283_v8 = vld [vmem:[#allocation7 + $0x188] sm:$0xff]  ;;  %801 = vmatprep.mubr.msk.f32.mxu1 %vm1092_vm1, %v1091_v0  ;;  %s651_s11 = sshll.u32 %s238_s7, 4  ;;  %s649_s27 = scalar_lea.hbm %s1367_s3, %s771_s18  ;;  %s652_s11 = int_to_ptr.vmem [resolvable:$true] %s651_s11 }
  0x67   : > { %335 = vmatpush1.msra.mxu0 %v251_v2  ;;  %v282_v9 = vld [vmem:[#allocation7 + $0x180] sm:$0xff]  ;;  %v281_v10 = vld [vmem:[#allocation7 + $0x170] sm:$0xff]  ;;  %v280_v11 = vld [vmem:[#allocation7 + $0x168] sm:$0xff]  ;;  %s638_s28 = scalar_lea.sflag [#allocation4], %s1269_s17  ;;  %s1009_s30 = scalar_lea.vmem %s652_s11, 128 }
  0x68   : > { %336 = vmatprep.subr.mxu0 %v249_v3  ;;  %v279_v12 = vld [vmem:[#allocation7 + $0x158] sm:$0xff]  ;;  %v278_v13 = vld [vmem:[#allocation7 + $0x150] sm:$0xff]  ;;  %v277_v14 = vld [vmem:[#allocation7 + $0x140] sm:$0xff]  ;;  %p1010_p3 = scmp.ne.s32.totalorder %s652_s11, %s1009_s30  ;;  %p1383_p10 = scmp.ne.s32.totalorder %s1377_s6, 0 }
  0x69   : > { %337 = vmatpush1.msra.mxu0 %v248_v4  ;;  %v276_v15 = vld [vmem:[#allocation7 + $0x138] sm:$0xff]  ;;  %v275_v16 = vld [vmem:[#allocation7 + $0x128] sm:$0xff]  ;;  %v274_v17 = vld [vmem:[#allocation7 + $0x120] sm:$0xff]  ;;  %s1093_s9 = smov [#allocation8]  }
  0x6a   : > { %766 = vmatmul.mubr.msk.f32.vlgmr.msra.gmra.mxu0 %vm302_vm0, %v1293_v5  ;;  %447 = vmatprep.subr.mxu0 %v285_v6  ;;  %v273_v18 = vld [vmem:[#allocation7 + $0x110] sm:$0xff]  ;;  %v272_v19 = vld [vmem:[#allocation7 + $0x108] sm:$0xff]  ;;  %v271_v20 = vld [vmem:[#allocation7 + $0xf8] sm:$0xff]  ;;  %p1011_p2 = pnand %p1010_p3, %p1383_p10  ;;  %s1013_s16 = sshll.u32 %s1093_s9, 4  ;;  %s1014_s16 = int_to_ptr.vmem [resolvable:$false] %s1013_s16 }
  0x6b   : > { %448 = vmatpush1.msra.mxu0 %v284_v7  ;;  %511 = vmatprep.mubr.f32.mxu0 %v1091_v0  ;;  %v270_v21 = vld [vmem:[#allocation7 + $0xf0] sm:$0xff]  ;;  %v269_v22 = vld [vmem:[#allocation7 + $0xe0] sm:$0xff]  ;;  %v1302_v24 = vld [vmem:[%s1281_s4 + $0x8] sm:$0xff]  ;;  %s1015_s10 = scalar_lea.vmem %s1014_s16, 256  ;;  %p1016_p13 = scmp.lt.s32.totalorder %s652_s11, %s1014_s16 }
  0x6c   : > { %449 = vmatprep.subr.mxu0 %v283_v8  ;;  %v1299_v23 = vld [vmem:[%s1281_s4] sm:$0xff]  ;;  %v268_v25 = vld [vmem:[#allocation7 + $0xd8] sm:$0xff]  ;;  %v267_v26 = vld [vmem:[#allocation7 + $0xc8] sm:$0xff]  ;;  %p1012_p12 = pneg %p1011_p2  ;;  %p1017_p0 = scmp.lt.s32.totalorder %s1015_s10, %s1009_s30 }
  0x6d   : > { %450 = vmatpush1.msra.mxu0 %v282_v9  ;;  %v266_v27 = vld [vmem:[#allocation7 + $0xc0] sm:$0xff]  ;;  %v244_v28 = vadd.f32 %v1302_v24, %v1299_v23  ;;  %v265_v29 = vld [vmem:[#allocation7 + $0xb0] sm:$0xff]  ;;  %v264_v31 = vld [vmem:[#allocation7 + $0xa8] sm:$0xff] }
  0x6e   : > { %451 = vmatprep.subr.mxu0 %v281_v10  ;;  %v1307_v30 = vld [vmem:[%s1281_s4 + $0x10] sm:$0xff]  ;;  %v263_v32 = vld [vmem:[#allocation7 + $0x98] sm:$0xff]  ;;  %v261_v35 = vld [vmem:[#allocation7 + $0x80] sm:$0xff]  ;;  %p1018_p5 = por %p1017_p0, %p1016_p13 }
  0x6f   : > { %452 = vmatpush1.msra.mxu0 %v280_v11  ;;  %v262_v33 = vld [vmem:[#allocation7 + $0x90] sm:$0xff]  ;;  %v245_v34 = vadd.f32 %v244_v28, %v1307_v30  ;;  %v1311_v36 = vld [vmem:[%s1281_s4 + $0x18] sm:$0xff]  ;;  %v259_v38 = vld [vmem:[#allocation7 + $0x68] sm:$0xff] }
  0x70   : > { %453 = vmatprep.subr.mxu0 %v279_v12  ;;  %v260_v37 = vld [vmem:[#allocation7 + $0x78] sm:$0xff]  ;;  %v258_v39 = vld [vmem:[#allocation7 + $0x60] sm:$0xff]  ;;  %v257_v41 = vld [vmem:[#allocation7 + $0x50] sm:$0xff]  ;;  %p1019_p9 = pnand %p1018_p5, %p1012_p12 }
  0x71   : > { %454 = vmatpush1.msra.mxu0 %v278_v13  ;;  %v246_v40 = vadd.f32 %v245_v34, %v1311_v36  ;;  %v256_v42 = vld [vmem:[#allocation7 + $0x48] sm:$0xff]  ;;  %v255_v43 = vld [vmem:[#allocation7 + $0x38] sm:$0xff]  ;;  %v254_v44 = vld [vmem:[#allocation7 + $0x30] sm:$0xff] }
  0x72   : > { %455 = vmatprep.subr.mxu0 %v277_v14  ;;  %v253_v46 = vld [vmem:[#allocation7 + $0x28] sm:$0xff]  ;;  %v250_v47 = vld [vmem:[#allocation7 + $0x10] sm:$0xff]  ;;  %v299_v50 = vld [vmem:[#allocation7 + $0x178] sm:$0xff] }
  0x73   : > { %456 = vmatpush1.msra.mxu0 %v276_v15  ;;  %v1314_v45 = vmul.f32 0.25, %v246_v40  ;;  %798 = vmatpush3.msra.mxu1 %v253_v46  ;;  %v301_v48 = vld [vmem:[#allocation7 + $0x1a8] sm:$0xff]  ;;  %v300_v49 = vld [vmem:[#allocation7 + $0x190] sm:$0xff]  ;;  %v298_v51 = vld [vmem:[#allocation7 + $0x160] sm:$0xff] }
  0x74   : > { %457 = vmatprep.subr.mxu0 %v275_v16  ;;  %799 = vmatprep.subr.mxu1 %v1091_v0  ;;  %v297_v52 = vld [vmem:[#allocation7 + $0x148] sm:$0xff]  ;;  %v296_v53 = vld [vmem:[#allocation7 + $0x130] sm:$0xff]  ;;  %v295_v54 = vld [vmem:[#allocation7 + $0x118] sm:$0xff] }
  0x75   : > { %458 = vmatpush1.msra.mxu0 %v274_v17  ;;  %800 = vmatpush3.msra.mxu1 %v250_v47  ;;  %v294_v55 = vld [vmem:[#allocation7 + $0x100] sm:$0xff]  ;;  %v293_v56 = vld [vmem:[#allocation7 + $0xe8] sm:$0xff]  ;;  %v292_v57 = vld [vmem:[#allocation7 + $0xd0] sm:$0xff] }
  0x76   : > { %459 = vmatprep.subr.mxu0 %v273_v18  ;;  %802 = vmatmul.mubr.msk.f32.vlgmr.msra.gmra.mxu1 %vm302_vm0, %v1293_v5  ;;  %v291_v58 = vld [vmem:[#allocation7 + $0xb8] sm:$0xff]  ;;  %v290_v59 = vld [vmem:[#allocation7 + $0xa0] sm:$0xff]  ;;  %v289_v60 = vld [vmem:[#allocation7 + $0x88] sm:$0xff] }
  0x77   : > { %460 = vmatpush1.msra.mxu0 %v272_v19  ;;  %804 = vmatprep.subr.mxu1 %v301_v48  ;;  %v288_v61 = vld [vmem:[#allocation7 + $0x70] sm:$0xff]  ;;  %v287_v62 = vld [vmem:[#allocation7 + $0x58] sm:$0xff]  ;;  %v286_v63 = vld [vmem:[#allocation7 + $0x40] sm:$0xff] }
  0x78   : > { %461 = vmatprep.subr.mxu0 %v271_v20  ;;  %805 = vmatpush3.msra.mxu1 %v301_v48 }
  0x79   : > { %462 = vmatpush1.msra.mxu0 %v270_v21  ;;  %806 = vmatprep.subr.mxu1 %v300_v49 }
  0x7a   : > { %463 = vmatprep.subr.mxu0 %v269_v22  ;;  %807 = vmatpush3.msra.mxu1 %v300_v49 }
  0x7b   : > { %464 = vmatpush1.msra.mxu0 %v268_v25  ;;  %808 = vmatprep.subr.mxu1 %v299_v50 }
  0x7c   : > { %465 = vmatprep.subr.mxu0 %v267_v26  ;;  %809 = vmatpush3.msra.mxu1 %v299_v50 }
  0x7d   : > { %466 = vmatpush1.msra.mxu0 %v266_v27  ;;  %810 = vmatprep.subr.mxu1 %v298_v51 }
  0x7e   : > { %467 = vmatprep.subr.mxu0 %v265_v29  ;;  %811 = vmatpush3.msra.mxu1 %v298_v51 }
  0x7f   : > { %468 = vmatpush1.msra.mxu0 %v264_v31  ;;  %812 = vmatprep.subr.mxu1 %v297_v52 }
  0x80   : > { %469 = vmatprep.subr.mxu0 %v263_v32  ;;  %813 = vmatpush3.msra.mxu1 %v297_v52 }
  0x81   : > { %470 = vmatpush1.msra.mxu0 %v262_v33  ;;  %814 = vmatprep.subr.mxu1 %v296_v53 }
  0x82   : > { %471 = vmatprep.subr.mxu0 %v261_v35  ;;  %815 = vmatpush3.msra.mxu1 %v296_v53 }
  0x83   : > { %472 = vmatpush1.msra.mxu0 %v260_v37  ;;  %816 = vmatprep.subr.mxu1 %v295_v54 }
  0x84   : > { %473 = vmatprep.subr.mxu0 %v259_v38  ;;  %817 = vmatpush3.msra.mxu1 %v295_v54 }
  0x85   : > { %474 = vmatpush1.msra.mxu0 %v258_v39  ;;  %818 = vmatprep.subr.mxu1 %v294_v55 }
  0x86   : > { %475 = vmatprep.subr.mxu0 %v257_v41  ;;  %819 = vmatpush3.msra.mxu1 %v294_v55 }
  0x87   : > { %476 = vmatpush1.msra.mxu0 %v256_v42  ;;  %820 = vmatprep.subr.mxu1 %v293_v56 }
  0x88   : > { %477 = vmatprep.subr.mxu0 %v255_v43  ;;  %821 = vmatpush3.msra.mxu1 %v293_v56 }
  0x89   : > { %478 = vmatpush1.msra.mxu0 %v254_v44  ;;  %822 = vmatprep.subr.mxu1 %v292_v57 }
  0x8a   : > { %512 = vmatmul.mubr.f32.vlgmr.msra.gmra.mxu0 %v1314_v45  ;;  %823 = vmatpush3.msra.mxu1 %v292_v57 }
  0x8b   : > { %824 = vmatprep.subr.mxu1 %v291_v58 }
  0x8c   : > { %825 = vmatpush3.msra.mxu1 %v291_v58 }
  0x8d   : > { %826 = vmatprep.subr.mxu1 %v290_v59 }
  0x8e   : > { %827 = vmatpush3.msra.mxu1 %v290_v59 }
  0x8f   : > { %828 = vmatprep.subr.mxu1 %v289_v60 }
  0x90   : > { %829 = vmatpush3.msra.mxu1 %v289_v60 }
  0x91   : > { %830 = vmatprep.subr.mxu1 %v288_v61 }
  0x92   : > { %831 = vmatpush3.msra.mxu1 %v288_v61 }
  0x93   : > { %832 = vmatprep.subr.mxu1 %v287_v62 }
  0x94   : > { %833 = vmatpush3.msra.mxu1 %v287_v62 }
  0x95   : > { %834 = vmatprep.subr.mxu1 %v286_v63 }
  0x96   : > { %835 = vmatpush3.msra.mxu1 %v286_v63 }
 0x12a   : > { %v372_v0 = vpop.f32.mrf.mxu0 }
 0x12c   : > { %v374_v1 = vpop.f32.mrf.mxu0 }
 0x136   : > { %v443_v12 = vpop.f32.mrf.mxu1 }
 0x138   : > { %v803_v13 = vpop.f32.mrf.mxu1 }
 0x14a   : > { %v513_v2 = vpop.f32.mrf.mxu0 }
 0x14b   : > { %v518_v3 = vadd.f32 %v513_v2, %v372_v0 }
 0x14c   : > { %v515_v14 = vpop.f32.mrf.mxu0 }
 0x14d   : > { %v768_v4 = vmul.f32 -1.442695, %v518_v3  ;;  %v525_v15 = vadd.f32 %v515_v14, %v374_v1 }
 0x14f   : > { %911 = vpow2.f32 %v768_v4  ;;  %v769_v16 = vmul.f32 -1.442695, %v525_v15 }
 0x15c   : > { %v912_v5 = vpop.eup %911 }
 0x15d   : > { %v522_v6 = vadd.f32 1.0, %v912_v5 }
 0x15f   : > { %913 = vrcp.f32 %v522_v6 }
 0x160   : > { %915 = vpow2.f32 %v769_v16 }
 0x16c   : > { %v914_v7 = vpop.eup %913 }
 0x16d   : > { %v532_v8 = vmul.f32 %v914_v7, %v1299_v23  ;;  %v533_v9 = vmul.f32 %v914_v7, %v1302_v24  ;;  %v534_v10 = vmul.f32 %v914_v7, %v1307_v30  ;;  %v535_v11 = vmul.f32 %v914_v7, %v1311_v36  ;;  %v916_v25 = vpop.eup %915 }
 0x16e   : > { %v529_v26 = vadd.f32 1.0, %v916_v25 }
 0x16f   : > { %836 = vmatprep.mubr.f32.mxu1 %v532_v8 }
 0x170   : > { %837 = vmatmul.mubr.f32.vlgmr.msra.gmra.mxu1 %v533_v9 }
 0x171   : > { %839 = vmatprep.mubr.f32.mxu1 %v534_v10 }
 0x174   : > { %840 = vmatmul.mubr.f32.gmra.mxu1 %v535_v11 }
 0x230   : > { %v838_v17 = vpop.f32.mrf.mxu1 }
 0x231   : > { %v622_v19 = vadd.f32 %v838_v17, %v443_v12 }
 0x232   : > { %v602_v18 = vpop.f32.mrf.mxu1 }
 0x233   : > { %v621_v20 = vadd.f32 %v602_v18, %v443_v12 }
 0x234   : > { %v841_v21 = vpop.f32.mrf.mxu1 }
 0x235   : > { %917 = vtanh.f32 %v621_v20  ;;  %v624_v23 = vadd.f32 %v841_v21, %v443_v12 }
 0x236   : > { %v612_v22 = vpop.f32.mrf.mxu1  ;;  %919 = vtanh.f32 %v622_v19 }
 0x237   : > { %v623_v24 = vadd.f32 %v612_v22, %v443_v12 }
 0x239   : > { %921 = vtanh.f32 %v623_v24 }
 0x23a   : > { %923 = vtanh.f32 %v624_v23 }
 0x23b   : > { %925 = vrcp.f32 %v529_v26 }
 0x242   : > { %v918_v27 = vpop.eup %917 }
 0x243   : > { %v920_v28 = vpop.eup %919 }
 0x244   : > { %v629_v29 = vadd.f32 %v920_v28, %v918_v27 }
 0x246   : > { %v922_v30 = vpop.eup %921 }
 0x247   : > { %v630_v31 = vadd.f32 %v922_v30, %v629_v29  ;;  %v924_v32 = vpop.eup %923 }
 0x248   : > { %v926_v36 = vpop.eup %925 }
 0x249   : > { %v631_v33 = vadd.f32 %v924_v32, %v630_v31 }
 0x24b   : > { %v632_v34 = vmul.f32 0.25, %v631_v33 }
 0x24d   : > { %v633_v35 = vsub.f32 %v632_v34, %v1314_v45 }
 0x24f   : > { %v634_v37 = vmul.f32 %v926_v36, %v633_v35 }
 0x251   : > { %v635_v38 = vadd.f32 %v634_v37, %v1314_v45 }
 0x253   : > { %636 = vst [vmem:[%s238_s7] sm:$0xff] %v635_v38 }
 0x254   : > { %1022 = shalt.err (!%p1019_p9)
}
 0x255   : > { %s1023_s22 = scalar_lea.hbm %s649_s27, 128  ;;  %s1027_s26 = scalar_lea.hbm %s1367_s3, 256 }
 0x256   : > { %p1024_p1 = scmp.ne.s32.totalorder %s649_s27, %s1023_s22  ;;  %p1028_p6 = scmp.lt.s32.totalorder %s649_s27, %s1367_s3 }
 0x257   : > { %p1029_p11 = scmp.lt.s32.totalorder %s1027_s26, %s1023_s22 }
 0x258   : > { %p1025_p4 = pnand %p1024_p1, %p1383_p10 }
 0x259   : > { %p1030_p8 = por %p1029_p11, %p1028_p6 }
 0x25a   : > { %p1026_p7 = pneg %p1025_p4 }
 0x25c   : > { %p1031_p3 = pnand %p1030_p8, %p1026_p7 }
 0x25e   : > { %1034 = shalt.err (!%p1031_p3)
}
 0x25f   : > { %850 = dma.vmem_to_hbm [thread:$0]  (%p1383_p10), %s652_s11, 128, %s649_s27, %s638_s28  }
 0x260 PF: > { %s663_s29 = sand.u32 1, %s1069_s12   ;;  %p1384_p2 = scmp.ne.s32.totalorder %s1373_s19, 0 }
 0x261   : > { %p1385_p12 = scmp.ge.s32.totalorder %s1081_s15, 2  ;;  %s664_s4 = scalar_lea.sflag [#allocation4], %s663_s29 }
 0x263   : > { %p864_p13 = pnand %p1385_p12, %p1384_p2 }
 0x265   : > { %p865_p0 = pneg %p864_p13 }
 0x267   : > { %1064 = dma.done.wait (%p865_p0), %s664_s4, 128  }
 0x268   : > { %1066 = vsyncadd (%p865_p0), %s664_s4, 4294967168  ;;  %p19_p5 = scmp.ge.s32.totalorder %s1168_s24, 4   ;;  %s1386_s12 = smov %s1073_s13 }
 0x269   : > { %s1387_s13 = smov %s1077_s14  ;;  %s1388_s14 = smov %s1185_s5 }
 0x26a   : > { %s1389_s15 = smov %s1168_s24  ;;  %21 = sbr.rel (!%p19_p5) target bundleno = 7 (0x7), region = 94 }
 0x26f   :  { %669 = vsyncpa [#allocation3], 1 }
 0x270   :  { %671 = vsyncpa [#allocation3 + $0x1], 1 }
 0x271   :  { %672 = vsyncpa [#allocation6], 1 }
 0x272   :  { %674 = vsyncpa [#allocation6 + $0x1], 1 }
 0x273   :  { %675 = vsyncpa [#allocation4], 1 }
 0x274   :  { %677 = vsyncpa [#allocation4 + $0x1], 1 }

</bundles_post_ra>
